<compile_context>
chip_gen: v6e
topology: v6e:2x2x1
jax: 0.10.0
libtpu: 0.0.40
codegen_flags: <defaults>
</compile_context>

<pallas_src>
import functools

import jax
import jax.numpy as jnp
from jax.experimental import pallas as pl
from jax.experimental.pallas import tpu as pltpu

HIDDEN = 256
HEAD_PAD = 128          # head weight padded to a full lane width
LN_EPS = 1e-5           # PyTorch nn.LayerNorm default
TILE_ALIGN = 16         # bf16-friendly sublane multiple


def _round_up(x, m):
    return ((x + m - 1) // m) * m


def _cdiv(a, b):
    return -(-a // b)


def _bf16_elementwise_ok():
    """True on chips with a bf16-native VPU (v6e / v7x); False otherwise."""
    try:
        kind = jax.devices()[0].device_kind.lower()
    except Exception:
        return False
    return ("v6" in kind) or ("v7" in kind) or ("tpu7" in kind)


def _ln_relu(z, gamma, beta, tail_bf16):
    """One-pass LayerNorm + ReLU; returns bf16 (fused cast, no extra pass).

    z: (TB, H) f32; gamma/beta: (1, H) f32.  Reductions and rsqrt stay f32.
    """
    h = z.shape[-1]
    inv_h = 1.0 / float(h)
    s1 = jnp.sum(z, axis=-1, keepdims=True)              # (TB, 1)
    s2 = jnp.sum(z * z, axis=-1, keepdims=True)          # (TB, 1)
    mean = s1 * inv_h
    var = jnp.maximum(s2 * inv_h - mean * mean, 0.0)     # clamp: padded rows
    inv = jax.lax.rsqrt(var + LN_EPS)                    # EUP slot
    if tail_bf16:
        # v6e/v7x: dominant elementwise tail in bf16 (2 elems / 32-bit lane).
        zb = z.astype(jnp.bfloat16)
        mb = mean.astype(jnp.bfloat16)
        ib = inv.astype(jnp.bfloat16)
        gb = gamma.astype(jnp.bfloat16)
        bb = beta.astype(jnp.bfloat16)
        return jnp.maximum((zb - mb) * ib * gb + bb, 0)
    # v5e: keep the tail f32 (no bf16 VALU); single fused cast at the end.
    return jnp.maximum((z - mean) * inv * gamma + beta, 0.0).astype(jnp.bfloat16)


def critic_kernel(sa_ref, w1_ref, w2_ref, w3_ref, vecs_ref, out_ref, *, tail_bf16):
    # Packed per-feature vectors: rows = b1, g1, be1, b2, g2, be2, b3(bcast).
    vecs = vecs_ref[...]                                  # (8, 256) f32
    b1, g1, be1 = vecs[0:1, :], vecs[1:2, :], vecs[2:3, :]
    b2, g2, be2 = vecs[3:4, :], vecs[4:5, :], vecs[5:6, :]
    b3 = vecs[6:7, :HEAD_PAD]                             # (1, 128), all = b3

    # Layer 1: fused (state|action|pad) matmul -> LayerNorm -> ReLU (bf16 out).
    z1 = jnp.dot(sa_ref[...], w1_ref[...],
                 preferred_element_type=jnp.float32) + b1
    h1 = _ln_relu(z1, g1, be1, tail_bf16)                 # (TB, 256) bf16

    # Layer 2.
    z2 = jnp.dot(h1, w2_ref[...],
                 preferred_element_type=jnp.float32) + b2
    h2 = _ln_relu(z2, g2, be2, tail_bf16)                 # (TB, 256) bf16

    # Head: w3 pre-padded to (256, 128) -> plain MXU matmul, unmasked
    # lane-dense (TB, 128) store; column 0 is the real q, rest discarded.
    q = jnp.dot(h2, w3_ref[...], preferred_element_type=jnp.float32)
    out_ref[...] = (q + b3).astype(out_ref.dtype)


def prepare_params(params, state_dim, action_dim):
    """One-time weight prep (pad / bf16 cast / vector packing) -- keep out of
    the per-call forward path."""
    (w1, b1, g1, be1, w2, b2, g2, be2, w3, b3) = params
    d_in = state_dim + action_dim
    kp = _round_up(max(d_in, 32), 32)                     # padded feature dim

    w1p = jnp.zeros((kp, HIDDEN), jnp.float32).at[:d_in, :].set(w1)
    w1p = w1p.astype(jnp.bfloat16)                        # (Kp, 256) bf16
    w2b = w2.astype(jnp.bfloat16)                         # (256, 256) bf16
    w3p = jnp.zeros((HIDDEN, HEAD_PAD), jnp.float32).at[:, 0:1].set(w3)
    w3p = w3p.astype(jnp.bfloat16)                        # (256, 128) bf16

    vecs = jnp.zeros((8, HIDDEN), jnp.float32)
    vecs = vecs.at[0, :].set(b1.reshape(-1))
    vecs = vecs.at[1, :].set(g1.reshape(-1))
    vecs = vecs.at[2, :].set(be1.reshape(-1))
    vecs = vecs.at[3, :].set(b2.reshape(-1))
    vecs = vecs.at[4, :].set(g2.reshape(-1))
    vecs = vecs.at[5, :].set(be2.reshape(-1))
    vecs = vecs.at[6, :].set(b3.reshape(())[()])          # broadcast scalar b3
    return {"w1": w1p, "w2": w2b, "w3": w3p, "vecs": vecs}


@functools.partial(jax.jit, static_argnames=("tile_b",))
def critic_forward(state, action, prepped, tile_b=1024):
    w1p, w2b, w3p, vecs = prepped["w1"], prepped["w2"], prepped["w3"], prepped["vecs"]
    B, S = state.shape
    A = action.shape[1]
    Kp = w1p.shape[0]

    # Large batch tile (amortize ~0.35us/step grid overhead), but never more
    # than half the batch so the "parallel" axis has >= 2 steps (v7x megacore).
    # Multiple of 16; VMEM stays well under the scoped default on all chips.
    half = _round_up(_cdiv(B, 2), TILE_ALIGN)
    tb = max(TILE_ALIGN, min(_round_up(int(tile_b), TILE_ALIGN), half))
    n_tiles = _cdiv(B, tb)
    Bp = n_tiles * tb
    pad_b = Bp - B

    # Single fused (state|action) bf16 input, feature-padded to Kp.
    sa = jnp.concatenate([state, action], axis=1).astype(jnp.bfloat16)
    sa_p = jnp.pad(sa, ((0, pad_b), (0, Kp - (S + A))))

    tail_bf16 = _bf16_elementwise_ok()

    def rep(shape):
        return pl.BlockSpec(shape, lambda i: tuple(0 for _ in shape))

    flops = 2 * Bp * (Kp * HIDDEN + HIDDEN * HIDDEN + HIDDEN * HEAD_PAD)
    transcendentals = 2 * Bp                               # one rsqrt per row per LN
    bytes_accessed = (
        Bp * Kp * 2                                        # fused input (bf16)
        + (Kp * HIDDEN + HIDDEN * HIDDEN + HIDDEN * HEAD_PAD) * 2   # weights once
        + 8 * HIDDEN * 4                                   # packed vectors once
        + Bp * HEAD_PAD * 4                                # lane-dense output
    )

    out = pl.pallas_call(
        functools.partial(critic_kernel, tail_bf16=tail_bf16),
        out_shape=jax.ShapeDtypeStruct((Bp, HEAD_PAD), jnp.float32),
        grid_spec=pl.GridSpec(
            grid=(n_tiles,),
            in_specs=[
                pl.BlockSpec((tb, Kp), lambda i: (i, 0)),  # fused state|action
                rep((Kp, HIDDEN)),                         # W1 (padded, bf16)
                rep((HIDDEN, HIDDEN)),                     # W2 (bf16)
                rep((HIDDEN, HEAD_PAD)),                   # W3 (padded, bf16)
                rep((8, HIDDEN)),                          # packed biases/LN/b3
            ],
            out_specs=pl.BlockSpec((tb, HEAD_PAD), lambda i: (i, 0)),
        ),
        compiler_params=pltpu.CompilerParams(
            dimension_semantics=("parallel",),
        ),
        cost_estimate=pl.CostEstimate(
            flops=int(flops),
            transcendentals=int(transcendentals),
            bytes_accessed=int(bytes_accessed),
        ),
    )(sa_p, w1p, w2b, w3p, vecs)

    # Column 0 holds q; drop the lane padding and the padded batch rows.
    return out[:B, 0:1]


def init_params(key, state_dim, action_dim):
    """nn.Linear U(-1/sqrt(fan_in), 1/sqrt(fan_in)); nn.LayerNorm (gamma=1, beta=0)."""
    d_in = state_dim + action_dim
    ks = jax.random.split(key, 6)

    def linear(kw, kb, fan_in, fan_out):
        bound = 1.0 / jnp.sqrt(jnp.float32(fan_in))
        w = jax.random.uniform(kw, (fan_in, fan_out), jnp.float32, -bound, bound)
        b = jax.random.uniform(kb, (1, fan_out), jnp.float32, -bound, bound)
        return w, b

    w1, b1 = linear(ks[0], ks[1], d_in, HIDDEN)
    w2, b2 = linear(ks[2], ks[3], HIDDEN, HIDDEN)
    w3, b3 = linear(ks[4], ks[5], HIDDEN, 1)
    g1 = jnp.ones((1, HIDDEN), jnp.float32); be1 = jnp.zeros((1, HIDDEN), jnp.float32)
    g2 = jnp.ones((1, HIDDEN), jnp.float32); be2 = jnp.zeros((1, HIDDEN), jnp.float32)
    return (w1, b1, g1, be1, w2, b2, g2, be2, w3, b3)


def reference_forward(state, action, params):
    """Pure-JAX f32 reference (matches the PyTorch module semantics)."""
    (w1, b1, g1, be1, w2, b2, g2, be2, w3, b3) = params
    sa = jnp.concatenate([state, action], axis=1).astype(jnp.float32)

    def ln(x, g, b):
        m = jnp.mean(x, -1, keepdims=True)
        v = jnp.mean((x - m) ** 2, -1, keepdims=True)
        return (x - m) / jnp.sqrt(v + LN_EPS) * g + b

    h1 = jnp.maximum(ln(sa @ w1 + b1, g1, be1), 0.0)
    h2 = jnp.maximum(ln(h1 @ w2 + b2, g2, be2), 0.0)
    return h2 @ w3 + b3


if __name__ == "__main__":
    key = jax.random.PRNGKey(0)
    k_p, k_s, k_a = jax.random.split(key, 3)

    state_dim, action_dim = 17, 6
    params = init_params(k_p, state_dim, action_dim)
    prepped = prepare_params(params, state_dim, action_dim)

    ok = True

    # Case 1: small batch, single tile (tile clamps down automatically).
    batch = 8
    state = jax.random.normal(k_s, (batch, state_dim), jnp.float32)
    action = jax.random.normal(k_a, (batch, action_dim), jnp.float32)
    q = critic_forward(state, action, prepped)
    jax.block_until_ready(q)
    q_ref = reference_forward(state, action, params)
    ok &= (q.shape == (batch, 1))
    ok &= bool(jnp.allclose(q, q_ref, atol=5e-2, rtol=5e-2))

    # Case 2: multi-tile grid with batch padding (lane-dense output path).
    batch2 = 40
    state2 = jax.random.normal(k_s, (batch2, state_dim), jnp.float32)
    action2 = jax.random.normal(k_a, (batch2, action_dim), jnp.float32)
    q2 = critic_forward(state2, action2, prepped, tile_b=16)
    jax.block_until_ready(q2)
    q2_ref = reference_forward(state2, action2, params)
    ok &= (q2.shape == (batch2, 1))
    ok &= bool(jnp.allclose(q2, q2_ref, atol=5e-2, rtol=5e-2))

    assert ok, "mismatch vs reference"
    print("KERNEL_OK")
</pallas_src>

<mosaic_0001>
module attributes {stable_mosaic.version = 11 : i64} {
  func.func @critic_kernel(%arg0: i32, %arg1: memref<16x32xbf16, #tpu.memory_space<vmem>>, %arg2: memref<32x256xbf16, #tpu.memory_space<vmem>>, %arg3: memref<256x256xbf16, #tpu.memory_space<vmem>>, %arg4: memref<256x128xbf16, #tpu.memory_space<vmem>>, %arg5: memref<8x256xf32, #tpu.memory_space<vmem>>, %arg6: memref<16x128xf32, #tpu.memory_space<vmem>>) attributes {dimension_semantics = [#tpu.dimension_semantics<parallel>], iteration_bounds = array<i64: 1>, scalar_prefetch = 0 : i64, scratch_operands = 0 : i64, tpu.core_type = #tpu.core_type<tc>, window_params = [{transform_indices = @transform_0, window_bounds = array<i64: 16, 32>}, {pipeline_mode = #tpu.pipeline_mode<synchronous>, transform_indices = @transform_1, window_bounds = array<i64: 32, 256>}, {pipeline_mode = #tpu.pipeline_mode<synchronous>, transform_indices = @transform_2, window_bounds = array<i64: 256, 256>}, {pipeline_mode = #tpu.pipeline_mode<synchronous>, transform_indices = @transform_3, window_bounds = array<i64: 256, 128>}, {pipeline_mode = #tpu.pipeline_mode<synchronous>, transform_indices = @transform_4, window_bounds = array<i64: 8, 256>}, {transform_indices = @transform_5, window_bounds = array<i64: 16, 128>}]} {
    %c0 = arith.constant 0 : index
    %c0_0 = arith.constant 0 : index
    %0 = vector.load %arg5[%c0, %c0_0] : memref<8x256xf32, #tpu.memory_space<vmem>>, vector<8x256xf32>
    %1 = vector.extract_strided_slice %0 {offsets = [0, 0], sizes = [1, 256], strides = [1, 1]} : vector<8x256xf32> to vector<1x256xf32>
    %2 = vector.extract_strided_slice %0 {offsets = [1, 0], sizes = [1, 256], strides = [1, 1]} : vector<8x256xf32> to vector<1x256xf32>
    %3 = vector.extract_strided_slice %0 {offsets = [2, 0], sizes = [1, 256], strides = [1, 1]} : vector<8x256xf32> to vector<1x256xf32>
    %4 = vector.extract_strided_slice %0 {offsets = [3, 0], sizes = [1, 256], strides = [1, 1]} : vector<8x256xf32> to vector<1x256xf32>
    %5 = vector.extract_strided_slice %0 {offsets = [4, 0], sizes = [1, 256], strides = [1, 1]} : vector<8x256xf32> to vector<1x256xf32>
    %6 = vector.extract_strided_slice %0 {offsets = [5, 0], sizes = [1, 256], strides = [1, 1]} : vector<8x256xf32> to vector<1x256xf32>
    %7 = vector.extract_strided_slice %0 {offsets = [6, 0], sizes = [1, 128], strides = [1, 1]} : vector<8x256xf32> to vector<1x128xf32>
    %c0_1 = arith.constant 0 : index
    %c0_2 = arith.constant 0 : index
    %8 = vector.load %arg1[%c0_1, %c0_2] : memref<16x32xbf16, #tpu.memory_space<vmem>>, vector<16x32xbf16>
    %c0_3 = arith.constant 0 : index
    %c0_4 = arith.constant 0 : index
    %9 = vector.load %arg2[%c0_3, %c0_4] : memref<32x256xbf16, #tpu.memory_space<vmem>>, vector<32x256xbf16>
    %cst = arith.constant dense<0.000000e+00> : vector<16x256xf32>
    %10 = tpu.matmul %8, %9, %cst {dimension_numbers = #tpu.dot_dimension_numbers<[1], [0], [0], [1], [0, 0, 1, 1], [], []>} : vector<16x32xbf16>, vector<32x256xbf16>, vector<16x256xf32> -> vector<16x256xf32>
    %11 = vector.broadcast %1 : vector<1x256xf32> to vector<16x256xf32>
    %12 = arith.addf %10, %11 : vector<16x256xf32>
    %cst_5 = arith.constant dense<0.000000e+00> : vector<16xf32>
    %13 = vector.multi_reduction <add>, %12, %cst_5 [1] : vector<16x256xf32> to vector<16xf32>
    %14 = vector.shape_cast %13 : vector<16xf32> to vector<16x1xf32>
    %15 = arith.mulf %12, %12 : vector<16x256xf32>
    %cst_6 = arith.constant dense<0.000000e+00> : vector<16xf32>
    %16 = vector.multi_reduction <add>, %15, %cst_6 [1] : vector<16x256xf32> to vector<16xf32>
    %17 = vector.shape_cast %16 : vector<16xf32> to vector<16x1xf32>
    %cst_7 = arith.constant 3.906250e-03 : f32
    %18 = vector.broadcast %cst_7 : f32 to vector<16x1xf32>
    %19 = arith.mulf %14, %18 : vector<16x1xf32>
    %cst_8 = arith.constant 3.906250e-03 : f32
    %20 = vector.broadcast %cst_8 : f32 to vector<16x1xf32>
    %21 = arith.mulf %17, %20 : vector<16x1xf32>
    %22 = arith.mulf %19, %19 : vector<16x1xf32>
    %23 = arith.subf %21, %22 : vector<16x1xf32>
    %cst_9 = arith.constant 0.000000e+00 : f32
    %24 = vector.broadcast %cst_9 : f32 to vector<16x1xf32>
    %25 = arith.maximumf %23, %24 : vector<16x1xf32>
    %cst_10 = arith.constant 9.99999974E-6 : f32
    %26 = vector.broadcast %cst_10 : f32 to vector<16x1xf32>
    %27 = arith.addf %25, %26 : vector<16x1xf32>
    %28 = math.rsqrt %27 : vector<16x1xf32>
    %29 = vector.broadcast %19 : vector<16x1xf32> to vector<16x256xf32>
    %30 = arith.subf %12, %29 : vector<16x256xf32>
    %31 = vector.broadcast %28 : vector<16x1xf32> to vector<16x256xf32>
    %32 = arith.mulf %30, %31 : vector<16x256xf32>
    %33 = vector.broadcast %2 : vector<1x256xf32> to vector<16x256xf32>
    %34 = arith.mulf %32, %33 : vector<16x256xf32>
    %35 = vector.broadcast %3 : vector<1x256xf32> to vector<16x256xf32>
    %36 = arith.addf %34, %35 : vector<16x256xf32>
    %cst_11 = arith.constant 0.000000e+00 : f32
    %37 = vector.broadcast %cst_11 : f32 to vector<16x256xf32>
    %38 = arith.maximumf %36, %37 : vector<16x256xf32>
    %39 = arith.truncf %38 : vector<16x256xf32> to vector<16x256xbf16>
    %c0_12 = arith.constant 0 : index
    %c0_13 = arith.constant 0 : index
    %40 = vector.load %arg3[%c0_12, %c0_13] : memref<256x256xbf16, #tpu.memory_space<vmem>>, vector<256x256xbf16>
    %cst_14 = arith.constant dense<0.000000e+00> : vector<16x256xf32>
    %41 = tpu.matmul %39, %40, %cst_14 {dimension_numbers = #tpu.dot_dimension_numbers<[1], [0], [0], [1], [0, 0, 1, 1], [], []>} : vector<16x256xbf16>, vector<256x256xbf16>, vector<16x256xf32> -> vector<16x256xf32>
    %42 = vector.broadcast %4 : vector<1x256xf32> to vector<16x256xf32>
    %43 = arith.addf %41, %42 : vector<16x256xf32>
    %cst_15 = arith.constant dense<0.000000e+00> : vector<16xf32>
    %44 = vector.multi_reduction <add>, %43, %cst_15 [1] : vector<16x256xf32> to vector<16xf32>
    %45 = vector.shape_cast %44 : vector<16xf32> to vector<16x1xf32>
    %46 = arith.mulf %43, %43 : vector<16x256xf32>
    %cst_16 = arith.constant dense<0.000000e+00> : vector<16xf32>
    %47 = vector.multi_reduction <add>, %46, %cst_16 [1] : vector<16x256xf32> to vector<16xf32>
    %48 = vector.shape_cast %47 : vector<16xf32> to vector<16x1xf32>
    %cst_17 = arith.constant 3.906250e-03 : f32
    %49 = vector.broadcast %cst_17 : f32 to vector<16x1xf32>
    %50 = arith.mulf %45, %49 : vector<16x1xf32>
    %cst_18 = arith.constant 3.906250e-03 : f32
    %51 = vector.broadcast %cst_18 : f32 to vector<16x1xf32>
    %52 = arith.mulf %48, %51 : vector<16x1xf32>
    %53 = arith.mulf %50, %50 : vector<16x1xf32>
    %54 = arith.subf %52, %53 : vector<16x1xf32>
    %cst_19 = arith.constant 0.000000e+00 : f32
    %55 = vector.broadcast %cst_19 : f32 to vector<16x1xf32>
    %56 = arith.maximumf %54, %55 : vector<16x1xf32>
    %cst_20 = arith.constant 9.99999974E-6 : f32
    %57 = vector.broadcast %cst_20 : f32 to vector<16x1xf32>
    %58 = arith.addf %56, %57 : vector<16x1xf32>
    %59 = math.rsqrt %58 : vector<16x1xf32>
    %60 = vector.broadcast %50 : vector<16x1xf32> to vector<16x256xf32>
    %61 = arith.subf %43, %60 : vector<16x256xf32>
    %62 = vector.broadcast %59 : vector<16x1xf32> to vector<16x256xf32>
    %63 = arith.mulf %61, %62 : vector<16x256xf32>
    %64 = vector.broadcast %5 : vector<1x256xf32> to vector<16x256xf32>
    %65 = arith.mulf %63, %64 : vector<16x256xf32>
    %66 = vector.broadcast %6 : vector<1x256xf32> to vector<16x256xf32>
    %67 = arith.addf %65, %66 : vector<16x256xf32>
    %cst_21 = arith.constant 0.000000e+00 : f32
    %68 = vector.broadcast %cst_21 : f32 to vector<16x256xf32>
    %69 = arith.maximumf %67, %68 : vector<16x256xf32>
    %70 = arith.truncf %69 : vector<16x256xf32> to vector<16x256xbf16>
    %c0_22 = arith.constant 0 : index
    %c0_23 = arith.constant 0 : index
    %71 = vector.load %arg4[%c0_22, %c0_23] : memref<256x128xbf16, #tpu.memory_space<vmem>>, vector<256x128xbf16>
    %cst_24 = arith.constant dense<0.000000e+00> : vector<16x128xf32>
    %72 = tpu.matmul %70, %71, %cst_24 {dimension_numbers = #tpu.dot_dimension_numbers<[1], [0], [0], [1], [0, 0, 1, 1], [], []>} : vector<16x256xbf16>, vector<256x128xbf16>, vector<16x128xf32> -> vector<16x128xf32>
    %73 = vector.broadcast %7 : vector<1x128xf32> to vector<16x128xf32>
    %74 = arith.addf %72, %73 : vector<16x128xf32>
    %c0_25 = arith.constant 0 : index
    %c0_26 = arith.constant 0 : index
    %75 = vector.load %arg6[%c0_25, %c0_26] : memref<16x128xf32, #tpu.memory_space<vmem>>, vector<16x128xf32>
    tpu.vector_store %arg6[%c0_25, %c0_26], %74 {strides = array<i32>} : memref<16x128xf32, #tpu.memory_space<vmem>>, vector<16x128xf32>,
    return
  }
  func.func @transform_0(%arg0: i32) -> (i32, i32) {
    %c0_i32 = arith.constant 0 : i32
    %c0_i32_0 = arith.constant 0 : i32
    return %arg0, %c0_i32 : i32, i32
  }
  func.func @transform_1(%arg0: i32) -> (i32, i32) {
    %c0_i32 = arith.constant 0 : i32
    %c0_i32_0 = arith.constant 0 : i32
    %c0_i32_1 = arith.constant 0 : i32
    return %c0_i32, %c0_i32_0 : i32, i32
  }
  func.func @transform_2(%arg0: i32) -> (i32, i32) {
    %c0_i32 = arith.constant 0 : i32
    %c0_i32_0 = arith.constant 0 : i32
    %c0_i32_1 = arith.constant 0 : i32
    return %c0_i32, %c0_i32_0 : i32, i32
  }
  func.func @transform_3(%arg0: i32) -> (i32, i32) {
    %c0_i32 = arith.constant 0 : i32
    %c0_i32_0 = arith.constant 0 : i32
    %c0_i32_1 = arith.constant 0 : i32
    return %c0_i32, %c0_i32_0 : i32, i32
  }
  func.func @transform_4(%arg0: i32) -> (i32, i32) {
    %c0_i32 = arith.constant 0 : i32
    %c0_i32_0 = arith.constant 0 : i32
    %c0_i32_1 = arith.constant 0 : i32
    return %c0_i32, %c0_i32_0 : i32, i32
  }
  func.func @transform_5(%arg0: i32) -> (i32, i32) {
    %c0_i32 = arith.constant 0 : i32
    %c0_i32_0 = arith.constant 0 : i32
    return %arg0, %c0_i32 : i32, i32
  }
}

</mosaic_0001>

<bundles_post_ra>
// kernel: critic_forward.1
= control target key start
LH: loop header
LB: loop body
LE: loop exit
PB: predicated region body
PF: predicated region fallthrough
CT: control target
= control target key end

     0   :  { %10 = vsyncpa [#allocation3], 0  ;;  %s1077_s0 = inlined_call_operand.vmem [shape: bf16[16,32], index: 0, kind: input, shape index: {}]   ;;  %s1078_s1 = inlined_call_operand.vmem [shape: bf16[32,256], index: 1, kind: input, shape index: {}]   ;;  %s1079_s2 = inlined_call_operand.hbm [shape: bf16[256,256], index: 2, kind: input, shape index: {}]   ;;  %s1080_s3 = inlined_call_operand.hbm [shape: bf16[256,128], index: 3, kind: input, shape index: {}]   ;;  %s1081_s4 = inlined_call_operand.hbm [shape: f32[8,256], index: 4, kind: input, shape index: {}]   ;;  %s1082_s5 = inlined_call_operand.vmem [shape: f32[16,128], index: 5, kind: output, shape index: {}]  }
   0x1   :  { %11 = vsyncpa [#allocation5], 0  ;;  %s935_s18 = smov [#allocation4]  }
   0x2   :  { %s33_s19 = sshll.u32 %s935_s18, 4  ;;  %s34_s19 = int_to_ptr.vmem [resolvable:$true] %s33_s19 }
   0x3   :  { %s879_s20 = scalar_lea.vmem %s34_s19, 2048  ;;  %p884_p1 = scmp.lt.s32.totalorder %s34_s19, %s34_s19 }
   0x4   :  { %p880_p0 = scmp.ne.s32.totalorder %s34_s19, %s879_s20  ;;  %p885_p2 = scmp.lt.s32.totalorder %s879_s20, %s879_s20 }
   0x6   :  { %p886_p3 = por %p885_p2, %p884_p1 }
   0x8   :  { %p887_p4 = pnand %p886_p3, %p880_p0 }
   0xa   :  { %890 = shalt.err (!%p887_p4)
}
   0xb   :  { %s936_s21 = smov 64   ;;  %s937_s22 = smov 4  }
   0xc   :  { %39 = dma.hbm_to_vmem [thread:$0]  %s1080_s3, 2048, %s34_s19, [#allocation5], %s936_s21, %s936_s21, %s937_s22  }
   0xd   :  { %s938_s25 = smov [#allocation2]  }
   0xe   :  { %s21_s26 = sshll.u32 %s938_s25, 4  ;;  %s22_s26 = int_to_ptr.vmem [resolvable:$true] %s21_s26 }
   0xf   :  { %s899_s27 = scalar_lea.vmem %s22_s26, 4096  ;;  %p904_p6 = scmp.lt.s32.totalorder %s22_s26, %s22_s26 }
  0x10   :  { %p900_p5 = scmp.ne.s32.totalorder %s22_s26, %s899_s27  ;;  %p905_p7 = scmp.lt.s32.totalorder %s899_s27, %s899_s27 }
  0x12   :  { %p906_p8 = por %p905_p7, %p904_p6 }
  0x14   :  { %p907_p9 = pnand %p906_p8, %p900_p5 }
  0x16   :  { %910 = shalt.err (!%p907_p9)
}
  0x17   :  { %s939_s28 = smov 128   ;;  %s940_s29 = smov 8  }
  0x18   :  { %27 = dma.hbm_to_vmem [thread:$0]  %s1079_s2, 4096, %s22_s26, [#allocation3], %s939_s28, %s939_s28, %s940_s29  }
  0x19   :  { %s941_s7 = smov [#allocation6]  }
  0x1a   :  { %s46_s8 = sshll.u32 %s941_s7, 4  ;;  %s47_s8 = int_to_ptr.vmem [resolvable:$true] %s46_s8 }
  0x1b   :  { %s919_s3 = scalar_lea.vmem %s47_s8, 256  ;;  %p924_p11 = scmp.lt.s32.totalorder %s47_s8, %s47_s8 }
  0x1c   :  { %p920_p10 = scmp.ne.s32.totalorder %s47_s8, %s919_s3  ;;  %p925_p12 = scmp.lt.s32.totalorder %s919_s3, %s919_s3 }
  0x1e   :  { %p926_p13 = por %p925_p12, %p924_p11 }
  0x20   :  { %p927_p0 = pnand %p926_p13, %p920_p10 }
  0x22   :  { %930 = shalt.err (!%p927_p0)
}
  0x23   :  { %49 = dma.hbm_to_vmem [thread:$0]  %s1081_s4, 256, %s47_s8, [#allocation5]  }
  0x24   :  { %931 = dma.done.wait [#allocation3], 4096  }
  0x25   :  { %932 = vsyncadd [#allocation3], 4294963200 }
  0x26   :  { %933 = dma.done.wait [#allocation5], 2304  }
  0x27   :  { %934 = vsyncadd [#allocation5], 4294964992  ;;  %v942_v0 = vmov 0   ;;  %v792_v1 = vld [vmem:[%s1078_s1 + $0x14] ss:$8 sps:$4 sm:$0xff]   ;;  %v798_v5 = vld [vmem:[%s1077_s0] sm:$0xff]   ;;  %v68_v19 = vlaneseq }
  0x28   :  { %137 = vmatprep.mubr.bf16.mxu0 %v942_v0  ;;  %v794_v2 = vld [vmem:[%s1078_s1 + $0x10] ss:$8 sps:$4 sm:$0xff]   ;;  %117 = vmatprep.subr.bf16.mxu0 %v792_v1  ;;  %v795_v3 = vld [vmem:[%s1078_s1 + $0x4] ss:$8 sps:$4 sm:$0xff]   ;;  %v797_v4 = vld [vmem:[%s1078_s1] ss:$8 sps:$4 sm:$0xff]  }
  0x29   :  { %118 = vmatpush1.bf16.msra.mxu0 %v794_v2  ;;  %vm101_vm0 = vcmask 261120   ;;  %v799_v6 = vld [vmem:[#allocation2 + $0x74] ss:$8 sps:$4 sm:$0xff]   ;;  %v801_v7 = vld [vmem:[#allocation2 + $0x70] ss:$8 sps:$4 sm:$0xff]   ;;  %v997_v20 = vshrl.u32 %v68_v19, 7 }
  0x2a   :  { %119 = vmatprep.subr.bf16.mxu0 %v795_v3  ;;  %v802_v8 = vld [vmem:[#allocation2 + $0x64] ss:$8 sps:$4 sm:$0xff]   ;;  %416 = vmatprep.subr.bf16.mxu1 %v799_v6  ;;  %v804_v9 = vld [vmem:[#allocation2 + $0x60] ss:$8 sps:$4 sm:$0xff]   ;;  %v805_v10 = vld [vmem:[#allocation2 + $0x54] ss:$8 sps:$4 sm:$0xff]  }
  0x2b   :  { %417 = vmatpush1.bf16.msra.mxu1 %v801_v7  ;;  %v807_v11 = vld [vmem:[#allocation2 + $0x50] ss:$8 sps:$4 sm:$0xff]   ;;  %v808_v12 = vld [vmem:[#allocation2 + $0x44] ss:$8 sps:$4 sm:$0xff]   ;;  %v810_v13 = vld [vmem:[#allocation2 + $0x40] ss:$8 sps:$4 sm:$0xff]  }
  0x2c   :  { %418 = vmatprep.subr.bf16.mxu1 %v802_v8  ;;  %v811_v14 = vld [vmem:[#allocation2 + $0x34] ss:$8 sps:$4 sm:$0xff]   ;;  %v813_v15 = vld [vmem:[#allocation2 + $0x30] ss:$8 sps:$4 sm:$0xff]   ;;  %v814_v16 = vld [vmem:[#allocation2 + $0x24] ss:$8 sps:$4 sm:$0xff]  }
  0x2d   :  { %120 = vmatpush1.bf16.msra.mxu0 %v797_v4  ;;  %v816_v17 = vld [vmem:[#allocation2 + $0x20] ss:$8 sps:$4 sm:$0xff]   ;;  %v817_v18 = vld [vmem:[#allocation2 + $0x14] ss:$8 sps:$4 sm:$0xff]   ;;  %v70_v21 = vsub.s32 0, %v997_v20 }
  0x2e   :  { %v1000_v22 = vld [vmem:[#allocation6] sm:$0xff]  ;;  %v1002_v23 = vld [vmem:[#allocation6 + $0x8] sm:$0xff]  ;;  %v819_v42 = vld [vmem:[#allocation2 + $0x10] ss:$8 sps:$4 sm:$0xff]  }
  0x2f   :  { %419 = vmatpush1.bf16.msra.mxu1 %v804_v9  ;;  %v71_v24 = vrot.slane %v1000_v22, %v70_v21  ;;  %v75_v25 = vrot.slane %v1002_v23, %v70_v21  ;;  %v820_v43 = vld [vmem:[#allocation2 + $0x4] ss:$8 sps:$4 sm:$0xff]   ;;  %v822_v44 = vld [vmem:[#allocation2] ss:$8 sps:$4 sm:$0xff]   ;;  %v823_v45 = vld [vmem:[#allocation2 + $0xf4] ss:$8 sps:$4 sm:$0xff]  }
  0x30   :  { %713 = vmatmul.mubr.msk.bf16.vlgmr.msra.gmra.mxu0 %vm101_vm0, %v798_v5  ;;  %420 = vmatprep.subr.bf16.mxu1 %v805_v10  ;;  %v825_v46 = vld [vmem:[#allocation2 + $0xf0] ss:$8 sps:$4 sm:$0xff]   ;;  %v826_v47 = vld [vmem:[#allocation2 + $0xe4] ss:$8 sps:$4 sm:$0xff]   ;;  %v828_v48 = vld [vmem:[#allocation2 + $0xe0] ss:$8 sps:$4 sm:$0xff]  }
  0x31   :  { %v829_v49 = vld [vmem:[#allocation2 + $0xd4] ss:$8 sps:$4 sm:$0xff]   ;;  %v831_v50 = vld [vmem:[#allocation2 + $0xd0] ss:$8 sps:$4 sm:$0xff]   ;;  %v832_v51 = vld [vmem:[#allocation2 + $0xc4] ss:$8 sps:$4 sm:$0xff]  }
  0x32   :  { %v834_v52 = vld [vmem:[#allocation2 + $0xc0] ss:$8 sps:$4 sm:$0xff]   ;;  %v835_v53 = vld [vmem:[#allocation2 + $0xb4] ss:$8 sps:$4 sm:$0xff]   ;;  %v837_v54 = vld [vmem:[#allocation2 + $0xb0] ss:$8 sps:$4 sm:$0xff]  }
  0x33   :  { %421 = vmatpush1.bf16.msra.mxu1 %v807_v11  ;;  %v838_v55 = vld [vmem:[#allocation2 + $0xa4] ss:$8 sps:$4 sm:$0xff]   ;;  %v840_v56 = vld [vmem:[#allocation2 + $0xa0] ss:$8 sps:$4 sm:$0xff]   ;;  %v841_v57 = vld [vmem:[#allocation2 + $0x94] ss:$8 sps:$4 sm:$0xff]  }
  0x34   :  { %422 = vmatprep.subr.bf16.mxu1 %v808_v12  ;;  %v843_v58 = vld [vmem:[#allocation2 + $0x90] ss:$8 sps:$4 sm:$0xff]   ;;  %v844_v59 = vld [vmem:[#allocation2 + $0x84] ss:$8 sps:$4 sm:$0xff]   ;;  %v846_v60 = vld [vmem:[#allocation2 + $0x80] ss:$8 sps:$4 sm:$0xff]  }
  0x37   :  { %423 = vmatpush1.bf16.msra.mxu1 %v810_v13  ;;  %v188_v13 = vsub.s32 1, %v997_v20 }
  0x38   :  { %424 = vmatprep.subr.bf16.mxu1 %v811_v14 }
  0x39   :  { %v189_v19 = vrot.slane %v1000_v22, %v188_v13 }
  0x3b   :  { %425 = vmatpush1.bf16.msra.mxu1 %v813_v15 }
  0x3c   :  { %426 = vmatprep.subr.bf16.mxu1 %v814_v16  ;;  %v200_v16 = vsub.s32 2, %v997_v20 }
  0x3f   :  { %427 = vmatpush1.bf16.msra.mxu1 %v816_v17 }
  0x40   :  { %428 = vmatprep.subr.bf16.mxu1 %v817_v18  ;;  %v193_v18 = vrot.slane %v1002_v23, %v188_v13  ;;  %v859_v13 = vld [vmem:[#allocation4 + $0x48] sm:$0xff]  }
  0x43   :  { %429 = vmatpush1.bf16.msra.mxu1 %v819_v42 }
  0x44   :  { %430 = vmatprep.subr.bf16.mxu1 %v820_v43 }
  0x47   :  { %431 = vmatpush1.bf16.msra.mxu1 %v822_v44 }
  0x48   :  { %432 = vmatprep.subr.bf16.mxu1 %v823_v45 }
  0x4b   :  { %433 = vmatpush2.bf16.msra.mxu1 %v825_v46 }
  0x4c   :  { %434 = vmatprep.subr.bf16.mxu1 %v826_v47 }
  0x4f   :  { %435 = vmatpush2.bf16.msra.mxu1 %v828_v48 }
  0x50   :  { %436 = vmatprep.subr.bf16.mxu1 %v829_v49 }
  0x53   :  { %437 = vmatpush2.bf16.msra.mxu1 %v831_v50 }
  0x54   :  { %438 = vmatprep.subr.bf16.mxu1 %v832_v51 }
  0x57   :  { %439 = vmatpush2.bf16.msra.mxu1 %v834_v52 }
  0x58   :  { %440 = vmatprep.subr.bf16.mxu1 %v835_v53 }
  0x5b   :  { %441 = vmatpush2.bf16.msra.mxu1 %v837_v54 }
  0x5c   :  { %442 = vmatprep.subr.bf16.mxu1 %v838_v55 }
  0x5f   :  { %443 = vmatpush2.bf16.msra.mxu1 %v840_v56 }
  0x60   :  { %444 = vmatprep.subr.bf16.mxu1 %v841_v57 }
  0x63   :  { %445 = vmatpush2.bf16.msra.mxu1 %v843_v58 }
  0x64   :  { %446 = vmatprep.subr.bf16.mxu1 %v844_v59 }
  0x67   :  { %447 = vmatpush2.bf16.msra.mxu1 %v846_v60 }
  0xf0   :  { %v139_v26 = vpop.f32.mrf.mxu0 }
  0xf1   :  { %v1006_v27 = vadd.f32 %v139_v26, %v71_v24  ;;  %v201_v26 = vrot.slane %v1000_v22, %v200_v16 }
  0xf2   :  { %v141_v28 = vpop.f32.mrf.mxu0 }
  0xf3   :  { %v1008_v29 = vadd.f32 %v141_v28, %v75_v25  ;;  %v154_v33 = vmul.f32 %v1006_v27, %v1006_v27 }
  0xf4   :  { %v143_v30 = vpop.f32.mrf.mxu0 }
  0xf5   :  { %v1010_v31 = vadd.f32 %v143_v30, %v71_v24  ;;  %v148_v32 = vadd.f32 %v1008_v29, %v1006_v27  ;;  %v155_v34 = vmul.f32 %v1008_v29, %v1008_v29 }
  0xf6   :  { %v145_v35 = vpop.f32.mrf.mxu0 }
  0xf7   :  { %v1018_v36 = vadd.f32 %v145_v35, %v75_v25  ;;  %149 = vadd.xlane.f32.xlu0 %v148_v32  ;;  %v158_v37 = vadd.f32 %v155_v34, %v154_v33  ;;  %v156_v39 = vmul.f32 %v1010_v31, %v1010_v31  ;;  %v205_v25 = vrot.slane %v1002_v23, %v200_v16  ;;  %v862_v16 = vld [vmem:[#allocation4] sm:$0xff]  }
  0xf9   :  { %159 = vadd.xlane.f32.xlu1 %v158_v37  ;;  %v151_v38 = vadd.f32 %v1018_v36, %v1010_v31  ;;  %v157_v40 = vmul.f32 %v1018_v36, %v1018_v36 }
  0xfb   :  { %152 = vadd.xlane.f32.xlu0 %v151_v38  ;;  %v161_v41 = vadd.f32 %v157_v40, %v156_v39 }
  0xfd   :  { %162 = vadd.xlane.f32.xlu1 %v161_v41 }
 0x180   :  { %v150_v61 = vpop.xlane.xlu0 %149 }
 0x181   :  { %v164_v62 = vmul.f32 0.00390625, %v150_v61 }
 0x182   :  { %v160_v63 = vpop.xlane.xlu1 %159 }
 0x183   :  { %v166_v0 = vmul.f32 0.00390625, %v160_v63  ;;  %v168_v1 = vmul.f32 %v164_v62, %v164_v62  ;;  %v178_v14 = vsub.f32 %v1006_v27, %v164_v62  ;;  %v179_v15 = vsub.f32 %v1008_v29, %v164_v62 }
 0x184   :  { %v153_v2 = vpop.xlane.xlu0 %152 }
 0x185   :  { %v170_v3 = vsub.f32 %v166_v0, %v168_v1  ;;  %v165_v4 = vmul.f32 0.00390625, %v153_v2  ;;  %v847_v1 = vld [vmem:[#allocation4 + $0x78] sm:$0xff]  }
 0x186   :  { %v163_v5 = vpop.xlane.xlu1 %162  ;;  %v848_v2 = vld [vmem:[#allocation4 + $0x38] sm:$0xff]   ;;  %762 = vmatprep.subr.bf16.mxu0 %v847_v1 }
 0x187   :  { %v172_v6 = vmax.f32 %v170_v3, 0.0  ;;  %v167_v7 = vmul.f32 0.00390625, %v163_v5  ;;  %v169_v8 = vmul.f32 %v165_v4, %v165_v4  ;;  %v180_v28 = vsub.f32 %v1010_v31, %v165_v4  ;;  %763 = vmatpush3.bf16.msra.mxu0 %v848_v2  ;;  %v849_v3 = vld [vmem:[#allocation4 + $0x70] sm:$0xff]   ;;  %v851_v5 = vld [vmem:[#allocation4 + $0x68] sm:$0xff]  }
 0x188   :  { %v181_v30 = vsub.f32 %v1018_v36, %v165_v4  ;;  %v250_v31 = vsub.s32 3, %v997_v20  ;;  %v850_v4 = vld [vmem:[#allocation4 + $0x30] sm:$0xff]   ;;  %764 = vmatprep.subr.bf16.mxu0 %v849_v3 }
 0x189   :  { %v174_v9 = vadd.f32 1e-05, %v172_v6  ;;  %v171_v10 = vsub.f32 %v167_v7, %v169_v8  ;;  %v852_v6 = vld [vmem:[#allocation4 + $0x28] sm:$0xff]   ;;  %v853_v7 = vld [vmem:[#allocation4 + $0x60] sm:$0xff]  }
 0x18a   :  { %v251_v36 = vrot.slane %v1000_v22, %v250_v31  ;;  %v255_v48 = vrot.slane %v1002_v23, %v250_v31  ;;  %v854_v8 = vld [vmem:[#allocation4 + $0x20] sm:$0xff]  }
 0x18b   :  { %863 = vrsqrt.f32 %v174_v9  ;;  %v173_v11 = vmax.f32 %v171_v10, 0.0  ;;  %765 = vmatpush3.bf16.msra.mxu0 %v850_v4  ;;  %v855_v9 = vld [vmem:[#allocation4 + $0x58] sm:$0xff]  }
 0x18c   :  { %766 = vmatprep.subr.bf16.mxu0 %v851_v5  ;;  %v856_v10 = vld [vmem:[#allocation4 + $0x18] sm:$0xff]  }
 0x18d   :  { %v175_v12 = vadd.f32 1e-05, %v173_v11  ;;  %v857_v11 = vld [vmem:[#allocation4 + $0x50] sm:$0xff]  }
 0x18f   :  { %865 = vrsqrt.f32 %v175_v12  ;;  %767 = vmatpush3.bf16.msra.mxu0 %v852_v6  ;;  %v858_v12 = vld [vmem:[#allocation4 + $0x10] sm:$0xff]  }
 0x190   :  { %768 = vmatprep.subr.bf16.mxu0 %v853_v7 }
 0x193   :  { %769 = vmatpush3.bf16.msra.mxu0 %v854_v8 }
 0x194   :  { %770 = vmatprep.subr.bf16.mxu0 %v855_v9 }
 0x197   :  { %771 = vmatpush3.bf16.msra.mxu0 %v856_v10 }
 0x198   :  { %v864_v17 = vpop.eup %863  ;;  %772 = vmatprep.subr.bf16.mxu0 %v857_v11 }
 0x199   :  { %v183_v21 = vmul.f32 %v864_v17, %v179_v15  ;;  %v182_v24 = vmul.f32 %v864_v17, %v178_v14  ;;  %v860_v14 = vld [vmem:[#allocation4 + $0x8] sm:$0xff]   ;;  %v861_v15 = vld [vmem:[#allocation4 + $0x40] sm:$0xff]  }
 0x19b   :  { %v195_v27 = vmul.f32 %v193_v18, %v183_v21  ;;  %v194_v32 = vmul.f32 %v189_v19, %v182_v24  ;;  %773 = vmatpush3.bf16.msra.mxu0 %v858_v12 }
 0x19c   :  { %v866_v29 = vpop.eup %865  ;;  %774 = vmatprep.subr.bf16.mxu0 %v859_v13 }
 0x19d   :  { %v185_v33 = vmul.f32 %v866_v29, %v181_v30  ;;  %v184_v34 = vmul.f32 %v866_v29, %v180_v28  ;;  %v207_v37 = vadd.f32 %v205_v25, %v195_v27  ;;  %v206_v39 = vadd.f32 %v201_v26, %v194_v32 }
 0x19f   :  { %v197_v35 = vmul.f32 %v193_v18, %v185_v33  ;;  %v196_v38 = vmul.f32 %v189_v19, %v184_v34  ;;  %v211_v42 = vmax.f32 %v207_v37, 0.0  ;;  %v210_v44 = vmax.f32 %v206_v39, 0.0  ;;  %775 = vmatpush3.bf16.msra.mxu0 %v860_v14 }
 0x1a0   :  { %776 = vmatprep.subr.bf16.mxu0 %v861_v15  ;;  %v511_v39 = vsub.s32 5, %v997_v20 }
 0x1a1   :  { %v209_v40 = vadd.f32 %v205_v25, %v197_v35  ;;  %v208_v41 = vadd.f32 %v201_v26, %v196_v38  ;;  %v499_v38 = vsub.s32 4, %v997_v20 }
 0x1a2   :  { %v512_v31 = vrot.slane %v1000_v22, %v511_v39 }
 0x1a3   :  { %v213_v43 = vmax.f32 %v209_v40, 0.0  ;;  %v212_v45 = vmax.f32 %v208_v41, 0.0  ;;  %777 = vmatpush3.bf16.msra.mxu0 %v862_v16 }
 0x1a5   :  { %v215_v46 = vpack.c.bf16 %v213_v43, %v211_v42  ;;  %v214_v47 = vpack.c.bf16 %v212_v45, %v210_v44  ;;  %v504_v42 = vrot.slane %v1002_v23, %v499_v38  ;;  %v500_v43 = vrot.slane %v1000_v22, %v499_v38 }
 0x1a7   :  { %448 = vmatprep.mubr.bf16.mxu1 %v215_v46 }
 0x1a8   :  { %449 = vmatmul.mubr.bf16.vlgmr.msra.gmra.mxu1 %v214_v47  ;;  %v516_v47 = vrot.slane %v1002_v23, %v511_v39 }
 0x268   :  { %v450_v49 = vpop.f32.mrf.mxu1 }
 0x269   :  { %v1039_v51 = vadd.f32 %v450_v49, %v251_v36 }
 0x26a   :  { %v452_v50 = vpop.f32.mrf.mxu1 }
 0x26b   :  { %v1041_v52 = vadd.f32 %v452_v50, %v255_v48  ;;  %v465_v59 = vmul.f32 %v1039_v51, %v1039_v51 }
 0x26c   :  { %v454_v53 = vpop.f32.mrf.mxu1 }
 0x26d   :  { %v459_v54 = vadd.f32 %v1041_v52, %v1039_v51  ;;  %v466_v55 = vmul.f32 %v1041_v52, %v1041_v52  ;;  %v1047_v57 = vadd.f32 %v454_v53, %v251_v36 }
 0x26e   :  { %v456_v56 = vpop.f32.mrf.mxu1 }
 0x26f   :  { %v1049_v58 = vadd.f32 %v456_v56, %v255_v48  ;;  %460 = vadd.xlane.f32.xlu0 %v459_v54  ;;  %v469_v61 = vadd.f32 %v466_v55, %v465_v59  ;;  %v467_v63 = vmul.f32 %v1047_v57, %v1047_v57 }
 0x271   :  { %v462_v60 = vadd.f32 %v1049_v58, %v1047_v57  ;;  %v468_v62 = vmul.f32 %v1049_v58, %v1049_v58 }
 0x273   :  { %463 = vadd.xlane.f32.xlu1 %v462_v60  ;;  %470 = vadd.xlane.f32.xlu0 %v469_v61  ;;  %v472_v0 = vadd.f32 %v468_v62, %v467_v63 }
 0x277   :  { %473 = vadd.xlane.f32.xlu1 %v472_v0 }
 0x2f8   :  { %v461_v17 = vpop.xlane.xlu0 %460 }
 0x2f9   :  { %v475_v18 = vmul.f32 0.00390625, %v461_v17 }
 0x2fb   :  { %v479_v25 = vmul.f32 %v475_v18, %v475_v18  ;;  %v489_v40 = vsub.f32 %v1039_v51, %v475_v18  ;;  %v490_v41 = vsub.f32 %v1041_v52, %v475_v18 }
 0x2fc   :  { %v464_v19 = vpop.xlane.xlu1 %463  ;;  %v471_v21 = vpop.xlane.xlu0 %470 }
 0x2fd   :  { %v476_v24 = vmul.f32 0.00390625, %v464_v19  ;;  %v477_v26 = vmul.f32 0.00390625, %v471_v21 }
 0x2ff   :  { %v481_v28 = vsub.f32 %v477_v26, %v479_v25  ;;  %v480_v32 = vmul.f32 %v476_v24, %v476_v24  ;;  %v491_v36 = vsub.f32 %v1047_v57, %v476_v24  ;;  %v492_v48 = vsub.f32 %v1049_v58, %v476_v24 }
 0x300   :  { %v474_v30 = vpop.xlane.xlu1 %473  ;;  %v561_v57 = vsub.s32 6, %v997_v20 }
 0x301   :  { %v483_v27 = vmax.f32 %v481_v28, 0.0  ;;  %v478_v29 = vmul.f32 0.00390625, %v474_v30 }
 0x302   :  { %v562_v3 = vrot.slane %v1000_v22, %v561_v57 }
 0x303   :  { %v485_v33 = vadd.f32 1e-05, %v483_v27  ;;  %v482_v34 = vsub.f32 %v478_v29, %v480_v32 }
 0x305   :  { %867 = vrsqrt.f32 %v485_v33  ;;  %v484_v35 = vmax.f32 %v482_v34, 0.0 }
 0x307   :  { %v486_v37 = vadd.f32 1e-05, %v484_v35 }
 0x309   :  { %869 = vrsqrt.f32 %v486_v37 }
 0x312   :  { %v868_v44 = vpop.eup %867 }
 0x313   :  { %v494_v45 = vmul.f32 %v868_v44, %v490_v41  ;;  %v493_v46 = vmul.f32 %v868_v44, %v489_v40 }
 0x315   :  { %v506_v49 = vmul.f32 %v504_v42, %v494_v45  ;;  %v505_v50 = vmul.f32 %v500_v43, %v493_v46 }
 0x316   :  { %v870_v51 = vpop.eup %869 }
 0x317   :  { %v496_v53 = vmul.f32 %v870_v51, %v492_v48  ;;  %v495_v52 = vmul.f32 %v870_v51, %v491_v36  ;;  %v518_v55 = vadd.f32 %v516_v47, %v506_v49  ;;  %v517_v59 = vadd.f32 %v512_v31, %v505_v50 }
 0x319   :  { %v508_v54 = vmul.f32 %v504_v42, %v496_v53  ;;  %v507_v56 = vmul.f32 %v500_v43, %v495_v52  ;;  %v522_v62 = vmax.f32 %v518_v55, 0.0  ;;  %v521_v23 = vmax.f32 %v517_v59, 0.0 }
 0x31b   :  { %v520_v60 = vadd.f32 %v516_v47, %v508_v54  ;;  %v519_v61 = vadd.f32 %v512_v31, %v507_v56 }
 0x31d   :  { %v524_v63 = vmax.f32 %v520_v60, 0.0  ;;  %v523_v0 = vmax.f32 %v519_v61, 0.0 }
 0x31f   :  { %v526_v1 = vpack.c.bf16 %v524_v63, %v522_v62  ;;  %v525_v2 = vpack.c.bf16 %v523_v0, %v521_v23 }
 0x321   :  { %691 = vmatprep.mubr.bf16.mxu0 %v526_v1 }
 0x322   :  { %692 = vmatmul.mubr.bf16.vlgmr.msra.gmra.mxu0 %v525_v2 }
 0x3e2   :  { %v778_v58 = vpop.f32.mrf.mxu0 }
 0x3e4   :  { %v779_v4 = vpop.f32.mrf.mxu0 }
 0x3e5   :  { %v780_v5 = vadd.f32 %v779_v4, %v778_v58 }
 0x3e6   :  { %v781_v6 = vpop.f32.mrf.mxu0 }
 0x3e7   :  { %v694_v7 = vadd.f32 %v780_v5, %v562_v3 }
 0x3e8   :  { %v782_v8 = vpop.f32.mrf.mxu0 }
 0x3e9   :  { %700 = vst [vmem:[%s1082_s5] sm:$0xff] %v694_v7  ;;  %v783_v9 = vadd.f32 %v782_v8, %v781_v6 }
 0x3eb   :  { %v697_v10 = vadd.f32 %v783_v9, %v562_v3 }
 0x3ed   :  { %701 = vst [vmem:[%s1082_s5 + $0x8] sm:$0xff] %v697_v10 }
 0x3ee   :  { %706 = vsyncpa [#allocation3], 1 }
 0x3ef   :  { %707 = vsyncpa [#allocation5], 1 }

</bundles_post_ra>
